<compile_context>
chip_gen: v7x
topology: tpu7x:2x2x1
jax: 0.10.0
libtpu: 0.0.40
codegen_flags: <defaults>
</compile_context>

<pallas_src>
import math
from functools import partial

import jax
import jax.numpy as jnp
from jax import lax
from jax.experimental import pallas as pl
from jax.experimental.pallas import tpu as pltpu


# ---------------------------------------------------------------------------
# Small helpers
# ---------------------------------------------------------------------------
def _pick_tile(dim, target, gran=8):
    """Largest multiple of `gran` dividing `dim` and <= target (else `dim`)."""
    if dim <= target:
        return dim
    start = target - (target % gran)
    for t in range(start, gran - 1, -gran):
        if dim % t == 0:
            return t
    return dim


def _vmem_budget_bytes():
    """Conservative scoped-VMEM budget per detected TPU generation."""
    try:
        kind = jax.devices()[0].device_kind.lower()
    except Exception:
        kind = ""
    if "v5" in kind or "v6" in kind:
        return 96 * 1024 * 1024          # 128 MiB physical VMEM -> generous budget
    return 48 * 1024 * 1024              # safe on v7x (64 MiB physical) and others


def _rev_cumsum_exclusive(x):
    """r[..., j] = sum_{t > j} x[..., t]  via a log2(S) shift-add doubling scan.

    Replaces the previous (TQ,S)x(S,S) lower-triangular matmul: O(S log S) VPU work,
    no S*S VMEM block, no extra MXU flops.  x is the (non-negative) softmax output,
    so there is no cancellation concern.
    """
    S = x.shape[-1]
    y = x
    k = 1
    while k < S:
        pad = jnp.zeros(x.shape[:-1] + (k,), x.dtype)
        y = y + jnp.concatenate([y[..., k:], pad], axis=-1)
        k *= 2
    return y - x


# ---------------------------------------------------------------------------
# Linear projection kernel: y = x @ Wt + b   (nn.Linear, W pre-transposed, bf16 MXU)
# ---------------------------------------------------------------------------
def _linear_kernel(x_ref, wt_ref, b_ref, o_ref):
    x = x_ref[...].astype(jnp.bfloat16)
    w = wt_ref[...].astype(jnp.bfloat16)
    acc = jnp.dot(x, w, preferred_element_type=jnp.float32)
    o_ref[...] = (acc + b_ref[...]).astype(o_ref.dtype)


def pallas_linear(x, w_t, b, *, out_dtype=None, target_tm=512, target_tn=512):
    # TODO(synk): for very large K a K-tile grid axis with a VMEM f32 accumulator
    # (pl.when init/finalize) would be needed; K stays untiled here.
    M, K = x.shape
    N = w_t.shape[1]
    out_dtype = out_dtype or x.dtype
    tm = _pick_tile(M, target_tm, gran=8)
    tn = _pick_tile(N, target_tn, gran=128)
    return pl.pallas_call(
        _linear_kernel,
        out_shape=jax.ShapeDtypeStruct((M, N), out_dtype),
        grid=(M // tm, N // tn),
        in_specs=[
            pl.BlockSpec((tm, K), lambda i, j: (i, 0)),
            pl.BlockSpec((K, tn), lambda i, j: (0, j)),   # weight resident per N-tile
            pl.BlockSpec((1, tn), lambda i, j: (0, j)),
        ],
        out_specs=pl.BlockSpec((tm, tn), lambda i, j: (i, j)),
        compiler_params=pltpu.CompilerParams(
            dimension_semantics=("parallel", "parallel"),
            vmem_limit_bytes=_vmem_budget_bytes()),
    )(x, w_t, b.reshape(1, N))


# ---------------------------------------------------------------------------
# Attention kernel: one (batch, head-group, query-tile) block per grid step
# ---------------------------------------------------------------------------
_LOG_MIN = math.log(1e-5)   # clip(exp(x), 1e-5, 1e5) == exp(max(x, log 1e-5)) since x <= 0


def _attention_kernel(gam_ref, q_ref, k_ref, v_ref, mask_ref, o_ref, s_ref,
                      *, maxout, sm_scale):
    G, TQ, Dh = q_ref.shape
    S = k_ref.shape[1]
    f32 = jnp.float32
    neg = f32(-1e32)

    q = q_ref[...].astype(jnp.bfloat16)          # (G, TQ, Dh)
    k = k_ref[...].astype(jnp.bfloat16)          # (G, S,  Dh)
    v = v_ref[...].astype(jnp.bfloat16)          # (G, S,  Dh)
    mask0 = (mask_ref[...] == 0.0)[None, :, :]   # (1, TQ, S), computed once, reused

    def softmax_last(x):
        m = jnp.max(x, axis=-1, keepdims=True)
        e = jnp.exp(x - m)
        # exact reciprocal for the softmax denominator (EUP), per review.
        return e * pl.reciprocal(jnp.sum(e, axis=-1, keepdims=True), approx=False)

    # scores = (q @ k^T) / sqrt(Dh) — bf16 operands, f32 accumulation on the MXU.
    scores = jnp.einsum('gqd,gkd->gqk', q, k,
                        preferred_element_type=jnp.float32) * f32(sm_scale)

    # --- position-decay ("gamma") effect ------------------------------------
    scores_ = softmax_last(jnp.where(mask0, neg, scores))
    rev = _rev_cumsum_exclusive(scores_)                      # == disttotal - distcum

    # |i - j| built in-kernel (no HBM fetch); row offset from the query tile index.
    q0 = pl.program_id(2) * TQ
    row = lax.broadcasted_iota(jnp.int32, (TQ, S), 0) + q0
    col = lax.broadcasted_iota(jnp.int32, (TQ, S), 1)
    pos = jnp.abs(col - row).astype(f32)                      # (TQ, S)

    dist = jnp.sqrt(jnp.maximum(rev * pos[None], 0.0))        # (G, TQ, S)
    gam = gam_ref[...]                                        # (G, 1, S): -|gamma_h|
    total_effect = jnp.exp(jnp.maximum(dist * gam, f32(_LOG_MIN)))
    scores = scores * total_effect

    # --- masked softmax ------------------------------------------------------
    scores = softmax_last(jnp.where(mask0, neg, scores))
    scores = jnp.where(mask0, f32(0.0), scores)

    if maxout:
        scale = jnp.minimum(
            pl.reciprocal(jnp.max(scores, axis=-1, keepdims=True), approx=True),
            f32(5.0))
        scores = scores * scale

    o_ref[...] = jnp.einsum('gqk,gkd->gqd', scores.astype(jnp.bfloat16), v,
                            preferred_element_type=jnp.float32).astype(o_ref.dtype)
    # TODO(synk): on v5e a bf16 (or optional) scores output would halve HBM writeback.
    s_ref[...] = scores.astype(s_ref.dtype)


def pallas_attention(q4, k4, v4, mask, gammas, *, maxout=False, target_tq=None):
    bs, h, S, Dh = q4.shape
    budget = _vmem_budget_bytes()
    if target_tq is None:
        target_tq = 512 if budget >= 96 * 1024 * 1024 else 128

    # mask: broadcastable to (bs, h, S, S); assumed head-invariant (typical usage).
    # TODO(synk): a head-dependent mask would need a (bs, h, S, S) mask input.
    if mask is None:
        m = jnp.ones((bs, S, S), jnp.float32)
    else:
        m = jnp.asarray(mask, jnp.float32)
        if m.ndim == 4:
            m = m[:, 0]
        elif m.ndim == 2:
            m = m[None]
        m = jnp.broadcast_to(m, (bs, S, S))

    # head grouping: fill the 128-lane vregs / MXU when d_head < 128.
    G = max(1, min(h, 128 // max(Dh, 1)))
    while h % G != 0:
        G -= 1

    # per-head -|gamma| rows, blockable as (G, 1, S) with full last-two dims.
    gamma_rows = jnp.broadcast_to((-jnp.abs(gammas)).reshape(h, 1, 1).astype(jnp.float32),
                                  (h, 1, S))

    TQ = _pick_tile(S, target_tq, gran=8)
    grid = (bs, h // G, S // TQ)

    gamma_spec = pl.BlockSpec((G, 1, S), lambda b, hg, qi: (hg, 0, 0))
    q_spec = pl.BlockSpec((None, G, TQ, Dh), lambda b, hg, qi: (b, hg, qi, 0))
    kv_spec = pl.BlockSpec((None, G, S, Dh), lambda b, hg, qi: (b, hg, 0, 0))
    mask_spec = pl.BlockSpec((None, TQ, S), lambda b, hg, qi: (b, qi, 0))
    out_spec = pl.BlockSpec((None, G, TQ, Dh), lambda b, hg, qi: (b, hg, qi, 0))
    sc_spec = pl.BlockSpec((None, G, TQ, S), lambda b, hg, qi: (b, hg, qi, 0))

    flops = 4 * bs * h * S * S * Dh                      # qk^T and scores@v
    transcendentals = 3 * bs * h * S * S                 # two softmax exps + decay exp
    bytes_accessed = (2 * 3 * bs * h * S * Dh            # q, k, v (bf16)
                      + 4 * bs * (h // G) * S * S        # mask fetched per head-group
                      + 2 * bs * h * S * Dh              # output (bf16)
                      + 4 * bs * h * S * S)              # f32 scores writeback

    return pl.pallas_call(
        partial(_attention_kernel, maxout=maxout, sm_scale=1.0 / math.sqrt(Dh)),
        out_shape=(jax.ShapeDtypeStruct((bs, h, S, Dh), q4.dtype),
                   jax.ShapeDtypeStruct((bs, h, S, S), jnp.float32)),
        grid=grid,
        in_specs=[gamma_spec, q_spec, kv_spec, kv_spec, mask_spec],
        out_specs=(out_spec, sc_spec),
        compiler_params=pltpu.CompilerParams(
            dimension_semantics=("parallel", "parallel", "parallel"),
            vmem_limit_bytes=budget),
        cost_estimate=pl.CostEstimate(flops=flops,
                                      transcendentals=transcendentals,
                                      bytes_accessed=bytes_accessed),
    )(gamma_rows, q4, k4, v4, m)


# ---------------------------------------------------------------------------
# Module wrapper (kq_same=True, bias=True, gammas=True)
# ---------------------------------------------------------------------------
class MultiHeadAttentionPallas:
    def __init__(self, d_model, n_heads, key, kq_same=True):
        assert d_model % n_heads == 0
        self.d_model = d_model
        self.h = n_heads
        self.d_head = d_model // n_heads
        self.kq_same = kq_same
        ks = jax.random.split(key, 9)
        bound = 1.0 / math.sqrt(d_model)

        def lin_params(kw, kb):
            w = jax.random.uniform(kw, (d_model, d_model), jnp.float32, -bound, bound)
            b = jax.random.uniform(kb, (d_model,), jnp.float32, -bound, bound)
            return w, b

        # f32 master weights (used by the reference); bf16 pre-transposed copies
        # for the kernels (one-time cast -> half the weight DMA, MXU-native dtype).
        self.wq, self.bq = lin_params(ks[0], ks[1])
        if kq_same:
            self.wk, self.bk = self.wq, self.bq
        else:
            self.wk, self.bk = lin_params(ks[7], ks[8])
        self.wv, self.bv = lin_params(ks[2], ks[3])
        self.wo, self.bo = lin_params(ks[4], ks[5])

        self.wq_t = self.wq.T.astype(jnp.bfloat16)
        self.wk_t = self.wk.T.astype(jnp.bfloat16)
        self.wv_t = self.wv.T.astype(jnp.bfloat16)
        self.wo_t = self.wo.T.astype(jnp.bfloat16)
        # stacked weight for the q is k is v fast path (single wider matmul).
        self.wqkv_t = jnp.concatenate([self.wq.T, self.wk.T, self.wv.T],
                                      axis=1).astype(jnp.bfloat16)
        self.bqkv = jnp.concatenate([self.bq, self.bk, self.bv])

        # gammas: (n_heads, 1, 1) learnable decay, deterministic uniform init.
        self.gammas = jax.random.uniform(ks[6], (n_heads, 1, 1), jnp.float32, -1.0, 1.0)

    def __call__(self, q, k, v, mask, maxout=False):
        bs, S, d = q.shape
        h, dh = self.h, self.d_head

        if (q is k) and (k is v):
            # self-attention fast path: one matmul with the stacked (d, 3d) weight.
            qkv = pallas_linear(q.reshape(bs * S, d), self.wqkv_t, self.bqkv,
                                out_dtype=jnp.bfloat16)
            qp, kp, vp = qkv[:, :d], qkv[:, d:2 * d], qkv[:, 2 * d:]
        else:
            qp = pallas_linear(q.reshape(bs * S, d), self.wq_t, self.bq,
                               out_dtype=jnp.bfloat16)
            kp = pallas_linear(k.reshape(bs * S, d), self.wk_t, self.bk,
                               out_dtype=jnp.bfloat16)
            vp = pallas_linear(v.reshape(bs * S, d), self.wv_t, self.bv,
                               out_dtype=jnp.bfloat16)

        # TODO(synk): the head split/merge transposes could be folded into the
        # attention kernel's BlockSpecs (strided DMA of dh-contiguous rows) to
        # save ~4 HBM passes over the activations at large S*d.
        def to_heads(x):
            return x.reshape(bs, S, h, dh).transpose(0, 2, 1, 3)   # (bs, h, S, dh)

        out4, scores = pallas_attention(
            to_heads(qp), to_heads(kp), to_heads(vp),
            mask, self.gammas.reshape(h), maxout=maxout)

        out = out4.transpose(0, 2, 1, 3).reshape(bs * S, d)
        out = pallas_linear(out, self.wo_t, self.bo,
                            out_dtype=jnp.float32).reshape(bs, S, d)
        return out, scores


# ---------------------------------------------------------------------------
# Pure-JAX f32 reference (mirrors the PyTorch forward exactly)
# ---------------------------------------------------------------------------
def reference_mha(q, k, v, mask, mod, maxout=False):
    bs, S, d = q.shape
    h, dh = mod.h, mod.d_head
    hp = jax.lax.Precision.HIGHEST

    def lin(x, w, b):
        return jnp.einsum('bsd,od->bso', x, w, precision=hp) + b

    def split(x):
        return x.reshape(bs, S, h, dh).transpose(0, 2, 1, 3)

    qp = split(lin(q, mod.wq, mod.bq))
    kp = split(lin(k, mod.wk, mod.bk))
    vp = split(lin(v, mod.wv, mod.bv))

    scores = jnp.einsum('bhqd,bhkd->bhqk', qp, kp, precision=hp) / math.sqrt(dh)
    mask0 = jnp.broadcast_to(mask, (bs, h, S, S)) == 0
    neg = jnp.float32(-1e32)

    scores_ = jax.nn.softmax(jnp.where(mask0, neg, scores), axis=-1)
    distcum = jnp.cumsum(scores_, axis=-1)
    disttotal = jnp.sum(scores_, axis=-1, keepdims=True)
    x1 = jnp.arange(S)[None, :]
    x2 = jnp.arange(S)[:, None]
    pe = jnp.abs(x1 - x2)[None, None].astype(jnp.float32)
    dist = jnp.sqrt(jnp.maximum((disttotal - distcum) * pe, 0.0))
    gamma = -jnp.abs(mod.gammas)[None]  # (1, h, 1, 1)
    total_effect = jnp.clip(jnp.exp(dist * gamma), 1e-5, 1e5)
    scores = scores * total_effect

    scores = jax.nn.softmax(jnp.where(mask0, neg, scores), axis=-1)
    scores = jnp.where(mask0, 0.0, scores)
    if maxout:
        scores = scores * jnp.minimum(
            1.0 / jnp.max(scores, axis=-1, keepdims=True), 5.0)

    out = jnp.einsum('bhqk,bhkd->bhqd', scores, vp, precision=hp)
    out = out.transpose(0, 2, 1, 3).reshape(bs, S, d)
    out = lin(out, mod.wo, mod.bo)
    return out, scores


if __name__ == "__main__":
    bs, S, d_model, n_heads = 2, 8, 32, 4
    key = jax.random.PRNGKey(0)
    kq, kk, kv, kp = jax.random.split(key, 4)

    q = jax.random.normal(kq, (bs, S, d_model), jnp.float32)
    k = jax.random.normal(kk, (bs, S, d_model), jnp.float32)
    v = jax.random.normal(kv, (bs, S, d_model), jnp.float32)
    # causal mask, broadcast over (batch, heads)
    mask = jnp.tril(jnp.ones((S, S), jnp.float32))[None, None]  # (1, 1, S, S)

    mod = MultiHeadAttentionPallas(d_model, n_heads, kp)

    # bf16 MXU operands (f32 accumulation) vs an f32 HIGHEST-precision reference:
    # a 3e-2 tolerance is appropriate and still catches any logic error.
    ATOL = RTOL = 3e-2
    ok = True
    for maxout in (False, True):
        out, scores = mod(q, k, v, mask, maxout=maxout)
        out = jax.block_until_ready(out)
        scores = jax.block_until_ready(scores)

        out_ref, scores_ref = reference_mha(q, k, v, mask, mod, maxout=maxout)
        assert out.shape == (bs, S, d_model)
        assert scores.shape == (bs, n_heads, S, S)
        ok &= bool(jnp.allclose(out, out_ref, atol=ATOL, rtol=RTOL))
        ok &= bool(jnp.allclose(scores, scores_ref, atol=ATOL, rtol=RTOL))

    assert ok, "numerical mismatch vs f32 reference"
    print("KERNEL_OK")
</pallas_src>

<mosaic_0001>
module attributes {stable_mosaic.version = 11 : i64} {
  func.func @_linear_kernel(%arg0: i32, %arg1: i32, %arg2: memref<16x32xf32, #tpu.memory_space<vmem>>, %arg3: memref<32x32xbf16, #tpu.memory_space<vmem>>, %arg4: memref<1x32xf32, #tpu.memory_space<vmem>>, %arg5: memref<16x32xbf16, #tpu.memory_space<vmem>>) attributes {dimension_semantics = [#tpu.dimension_semantics<parallel>, #tpu.dimension_semantics<parallel>], iteration_bounds = array<i64: 1, 1>, scalar_prefetch = 0 : i64, scratch_operands = 0 : i64, tpu.core_type = #tpu.core_type<tc>, window_params = [{transform_indices = @transform_0, window_bounds = array<i64: 16, 32>}, {transform_indices = @transform_1, window_bounds = array<i64: 32, 32>}, {transform_indices = @transform_2, window_bounds = array<i64: 1, 32>}, {transform_indices = @transform_3, window_bounds = array<i64: 16, 32>}]} {
    %c0 = arith.constant 0 : index
    %c0_0 = arith.constant 0 : index
    %0 = vector.load %arg2[%c0, %c0_0] : memref<16x32xf32, #tpu.memory_space<vmem>>, vector<16x32xf32>
    %1 = arith.truncf %0 : vector<16x32xf32> to vector<16x32xbf16>
    %c0_1 = arith.constant 0 : index
    %c0_2 = arith.constant 0 : index
    %2 = vector.load %arg3[%c0_1, %c0_2] : memref<32x32xbf16, #tpu.memory_space<vmem>>, vector<32x32xbf16>
    %cst = arith.constant dense<0.000000e+00> : vector<16x32xf32>
    %3 = tpu.matmul %1, %2, %cst {dimension_numbers = #tpu.dot_dimension_numbers<[1], [0], [0], [1], [0, 0, 1, 1], [], []>} : vector<16x32xbf16>, vector<32x32xbf16>, vector<16x32xf32> -> vector<16x32xf32>
    %c0_3 = arith.constant 0 : index
    %c0_4 = arith.constant 0 : index
    %4 = vector.load %arg4[%c0_3, %c0_4] : memref<1x32xf32, #tpu.memory_space<vmem>>, vector<1x32xf32>
    %5 = vector.broadcast %4 : vector<1x32xf32> to vector<16x32xf32>
    %6 = arith.addf %3, %5 : vector<16x32xf32>
    %7 = arith.truncf %6 : vector<16x32xf32> to vector<16x32xbf16>
    %c0_5 = arith.constant 0 : index
    %c0_6 = arith.constant 0 : index
    %8 = vector.load %arg5[%c0_5, %c0_6] : memref<16x32xbf16, #tpu.memory_space<vmem>>, vector<16x32xbf16>
    tpu.vector_store %arg5[%c0_5, %c0_6], %7 {strides = array<i32>} : memref<16x32xbf16, #tpu.memory_space<vmem>>, vector<16x32xbf16>,
    return
  }
  func.func @transform_0(%arg0: i32, %arg1: i32) -> (i32, i32) {
    %c0_i32 = arith.constant 0 : i32
    %c0_i32_0 = arith.constant 0 : i32
    return %arg0, %c0_i32 : i32, i32
  }
  func.func @transform_1(%arg0: i32, %arg1: i32) -> (i32, i32) {
    %c0_i32 = arith.constant 0 : i32
    %c0_i32_0 = arith.constant 0 : i32
    return %c0_i32, %arg1 : i32, i32
  }
  func.func @transform_2(%arg0: i32, %arg1: i32) -> (i32, i32) {
    %c0_i32 = arith.constant 0 : i32
    %c0_i32_0 = arith.constant 0 : i32
    return %c0_i32, %arg1 : i32, i32
  }
  func.func @transform_3(%arg0: i32, %arg1: i32) -> (i32, i32) {
    %c0_i32 = arith.constant 0 : i32
    return %arg0, %arg1 : i32, i32
  }
}

</mosaic_0001>

<bundles_post_ra>
// kernel: tpu_custom_call.1
= control target key start
LH: loop header
LB: loop body
LE: loop exit
PB: predicated region body
PF: predicated region fallthrough
CT: control target
= control target key end

     0   :  { %8 = vsyncpa [#allocation3], 0  ;;  %s320_s0 = inlined_call_operand.hbm [shape: f32[16,32], index: 0, kind: input, shape index: {}]   ;;  %s321_s1 = inlined_call_operand.hbm [shape: bf16[32,32], index: 1, kind: input, shape index: {}]   ;;  %s322_s2 = inlined_call_operand.vmem [shape: f32[1,32], index: 2, kind: input, shape index: {}]   ;;  %s323_s3 = inlined_call_operand.hbm [shape: bf16[16,32], index: 3, kind: output, shape index: {}]  }
   0x1   :  { %9 = vsyncpa [#allocation6], 0 }
   0x2   :  { %10 = vsyncpa [#allocation4], 0  ;;  %s246_s12 = smov [#allocation2]   ;;  %s174_s16 = scalar_lea.hbm %s320_s0, 256 }
   0x3   :  { %s16_s13 = sshll.u32 %s246_s12, 4  ;;  %p175_p0 = scmp.ne.s32.totalorder %s320_s0, %s174_s16  ;;  %s17_s13 = int_to_ptr.vmem [resolvable:$true] %s16_s13 }
   0x4   :  { %p178_p1 = scmp.lt.u32.totalorder %s174_s16, %s320_s0 }
   0x6   :  { %p180_p2 = pnand %p178_p1, %p175_p0 }
   0x8   :  { %183 = shalt.err (!%p180_p2)
}
   0x9   :  { %s184_s21 = scalar_lea.vmem %s17_s13, 256  ;;  %p189_p4 = scmp.lt.s32.totalorder %s17_s13, %s17_s13 }
   0xa   :  { %p185_p3 = scmp.ne.s32.totalorder %s17_s13, %s184_s21  ;;  %p190_p5 = scmp.lt.s32.totalorder %s184_s21, %s184_s21 }
   0xc   :  { %p191_p6 = por %p190_p5, %p189_p4 }
   0xe   :  { %p192_p7 = pnand %p191_p6, %p185_p3 }
  0x10   :  { %195 = shalt.err (!%p192_p7)
}
  0x11   :  { %s247_s22 = smov 128   ;;  %s248_s23 = smov 8  }
  0x12   :  { %22 = dma.hbm_to_vmem [thread:$0]  %s320_s0, 256, %s17_s13, [#allocation3], %s247_s22, %s247_s22, %s248_s23  }
  0x13   :  { %s249_s26 = smov [#allocation5]   ;;  %s196_s30 = scalar_lea.hbm %s321_s1, 256 }
  0x14   :  { %s28_s27 = sshll.u32 %s249_s26, 4  ;;  %p197_p8 = scmp.ne.s32.totalorder %s321_s1, %s196_s30  ;;  %s29_s27 = int_to_ptr.vmem [resolvable:$true] %s28_s27 }
  0x15   :  { %p200_p9 = scmp.lt.u32.totalorder %s196_s30, %s321_s1 }
  0x17   :  { %p202_p10 = pnand %p200_p9, %p197_p8 }
  0x19   :  { %205 = shalt.err (!%p202_p10)
}
  0x1a   :  { %s206_s8 = scalar_lea.vmem %s29_s27, 256  ;;  %p211_p12 = scmp.lt.s32.totalorder %s29_s27, %s29_s27 }
  0x1b   :  { %p207_p11 = scmp.ne.s32.totalorder %s29_s27, %s206_s8  ;;  %p212_p13 = scmp.lt.s32.totalorder %s206_s8, %s206_s8 }
  0x1d   :  { %p213_p0 = por %p212_p13, %p211_p12 }
  0x1f   :  { %p214_p1 = pnand %p213_p0, %p207_p11 }
  0x21   :  { %217 = shalt.err (!%p214_p1)
}
  0x22   :  { %s250_s0 = smov 64   ;;  %s251_s9 = smov 4  }
  0x23   :  { %34 = dma.hbm_to_vmem [thread:$0]  %s321_s1, 256, %s29_s27, [#allocation6], %s250_s0, %s250_s0, %s251_s9  }
  0x24   :  { %240 = dma.done.wait [#allocation3], 256  }
  0x25   :  { %241 = vsyncadd [#allocation3], 4294967040 }
  0x26   :  { %242 = dma.done.wait [#allocation6], 256  }
  0x27   :  { %243 = vsyncadd [#allocation6], 4294967040  ;;  %v252_v0 = vmov 0.0   ;;  %vm253_vm0 = vmmov 0   ;;  %v172_v1 = vld [vmem:[#allocation5] sm:$0xff]   ;;  %v173_v2 = vld [vmem:[#allocation5 + $0x8] sm:$0xff]  }
  0x28   :  { %155 = vmatprep.subr.bf16.mxu0 %v252_v0  ;;  %159 = vmatprep.mubr.msk.bf16.mxu0 %vm253_vm0, %v252_v0  ;;  %v44_v3 = vld [vmem:[#allocation2] sm:$0xff]  ;;  %v45_v4 = vld [vmem:[#allocation2 + $0x8] sm:$0xff]  ;;  %vm70_vm1 = vcmask 261120   ;;  %vm123_vm2 = vcmask 257024   ;;  %s254_s13 = smov [#allocation7]  }
  0x29   :  { %156 = vmatpush3.bf16.msra.mxu0 %v172_v1  ;;  %v46_v5 = vpack.c.bf16 %v45_v4, %v44_v3  ;;  %v144_v6 = vld [vmem:[%s322_s2] ss:$0 sm:$0xff]  ;;  %s131_s14 = sshll.u32 %s254_s13, 4  ;;  %s132_s14 = int_to_ptr.vmem [resolvable:$true] %s131_s14 }
  0x2a   :  { %157 = vmatprep.subr.bf16.mxu0 %v252_v0  ;;  %s218_s15 = scalar_lea.vmem %s132_s14, 128  ;;  %p223_p3 = scmp.lt.s32.totalorder %s132_s14, %s132_s14 }
  0x2b   :  { %p219_p2 = scmp.ne.s32.totalorder %s132_s14, %s218_s15  ;;  %p224_p4 = scmp.lt.s32.totalorder %s218_s15, %s218_s15 }
  0x2d   :  { %158 = vmatpush3.bf16.msra.mxu0 %v173_v2  ;;  %p225_p5 = por %p224_p4, %p223_p3 }
  0x2f   :  { %p226_p6 = pnand %p225_p5, %p219_p2 }
  0x30   :  { %160 = vmatmul.mubr.msk.bf16.vlgmr.msra.gmra.mrb[0].mxu0 %vm70_vm1, %v46_v5 }
 0x103   :  { %v108_v7 = vpop.f32.mrb[0].mxu0 }
 0x104   :  { %v109_v8 = vadd.f32 %v144_v6, %v108_v7  ;;  %v161_v9 = vpop.f32.mrb[1].mxu0 }
 0x105   :  { %v111_v10 = vpop.f32.mrb[2].mxu0 }
 0x106   :  { %v150_v11 = vpack.c.bf16 %v109_v8, %v109_v8  ;;  %v112_v12 = vadd.f32 %v144_v6, %v111_v10  ;;  %v162_v13 = vpop.f32.mrb[3].mxu0 }
 0x108   :  { %v151_v14 = vpack.c.bf16 %v112_v12, %v112_v12  ;;  %124 = vst.msk [vmem:[#allocation7] sm:$0xf] %vm123_vm2, %v150_v11 }
 0x10a   :  { %125 = vst.msk [vmem:[#allocation7 + $0x4] sm:$0xf] %vm123_vm2, %v151_v14 }
 0x10b   :  { %229 = shalt.err (!%p226_p6)
}
 0x10c   :  { %s230_s17 = scalar_lea.hbm %s323_s3, 128 }
 0x10d   :  { %p231_p7 = scmp.ne.s32.totalorder %s323_s3, %s230_s17  ;;  %p234_p8 = scmp.lt.u32.totalorder %s230_s17, %s323_s3 }
 0x10f   :  { %p236_p9 = pnand %p234_p8, %p231_p7 }
 0x111   :  { %239 = shalt.err (!%p236_p9)
}
 0x112   :  { %137 = dma.vmem_to_hbm [thread:$0]  %s132_s14, 128, %s323_s3, [#allocation4], %s250_s0, %s250_s0, %s251_s9  }
 0x113   :  { %244 = dma.done.wait [#allocation4], 128  }
 0x114   :  { %245 = vsyncadd [#allocation4], 4294967168 }
 0x115   :  { %141 = vsyncpa [#allocation3], 1 }
 0x116   :  { %142 = vsyncpa [#allocation6], 1 }
 0x117   :  { %143 = vsyncpa [#allocation4], 1 }

</bundles_post_ra>
